<compile_context>
chip_gen: v7x
topology: tpu7x:2x2x1
jax: 0.10.0
libtpu: 0.0.40
codegen_flags: <defaults>
</compile_context>

<pallas_src>
import functools

import jax
import jax.numpy as jnp
from jax.experimental import pallas as pl
from jax.experimental.pallas import tpu as pltpu


def _value_net_kernel(x_ref, w1_ref, b1_ref, w2_ref, b2_ref, w3_ref, b3_ref,
                      o_ref, *, matmul_dtype):
    """One batch tile: (TILE_B, state_dim) -> (TILE_B, 1)."""
    x = x_ref[...]                                         # (TILE_B, S) f32

    # linear1 + relu  (MXU matmul, f32 accumulation; bias/ReLU on VPU in f32)
    h1 = jnp.dot(x.astype(matmul_dtype), w1_ref[...].astype(matmul_dtype),
                 preferred_element_type=jnp.float32)
    h1 = jnp.maximum(h1 + b1_ref[...], 0.0)                # (TILE_B, H)

    # linear2 + relu
    h2 = jnp.dot(h1.astype(matmul_dtype), w2_ref[...].astype(matmul_dtype),
                 preferred_element_type=jnp.float32)
    h2 = jnp.maximum(h2 + b2_ref[...], 0.0)                # (TILE_B, H)

    # linear3 (out_features == 1): VPU multiply + lane reduction, no MXU pass.
    y = jnp.sum(h2 * w3_ref[...], axis=-1, keepdims=True) + b3_ref[...]
    o_ref[...] = y                                         # (TILE_B, 1)


def _round_up(x, m):
    return ((x + m - 1) // m) * m


@functools.partial(jax.jit, static_argnames=("tile_b", "matmul_dtype"))
def value_network_forward(state, params, *, tile_b=256,
                          matmul_dtype=jnp.float32):
    """state: (B, state_dim) float32 -> (B, 1) float32."""
    w1, b1 = params["w1"], params["b1"]
    w2, b2 = params["w2"], params["b2"]
    w3, b3 = params["w3"], params["b3"]

    B, state_dim = state.shape

    # Tile size: multiple of 8 (sublanes); don't over-pad tiny batches.
    tb = min(_round_up(tile_b, 8), _round_up(max(B, 1), 8))
    n_tiles = pl.cdiv(B, tb)
    b_pad = n_tiles * tb
    if b_pad != B:
        state = jnp.pad(state, ((0, b_pad - B), (0, 0)))

    def resident(arr):
        # Full-array block with a constant index_map: DMA'd once, then stays
        # resident in VMEM for every grid step (no per-step re-fetch).
        return pl.BlockSpec(arr.shape, lambda i: (0, 0))

    kernel = functools.partial(_value_net_kernel, matmul_dtype=matmul_dtype)

    out = pl.pallas_call(
        kernel,
        out_shape=jax.ShapeDtypeStruct((b_pad, 1), jnp.float32),
        grid=(n_tiles,),
        in_specs=[
            pl.BlockSpec((tb, state_dim), lambda i: (i, 0)),   # streamed
            resident(w1), resident(b1),
            resident(w2), resident(b2),
            resident(w3), resident(b3),
        ],
        out_specs=pl.BlockSpec((tb, 1), lambda i: (i, 0)),
        compiler_params=pltpu.CompilerParams(
            dimension_semantics=("parallel",)),                # v7x: 2 TCs
    )(state, w1, b1, w2, b2, w3, b3)

    return out[:B]


def init_value_network_params(key, state_dim, hidden_dim, init_w=0.003):
    """Parameter init mirroring the PyTorch module.

    linear1/linear2: U(-1/sqrt(fan_in), 1/sqrt(fan_in)) (PyTorch default);
    linear3: U(-init_w, init_w).  w1/w2 stored as (in, out); w3 as (1, hidden).
    """
    k1, k2, k3, k4, k5, k6 = jax.random.split(key, 6)
    lim1 = 1.0 / (state_dim ** 0.5)
    lim2 = 1.0 / (hidden_dim ** 0.5)
    return {
        "w1": jax.random.uniform(k1, (state_dim, hidden_dim), jnp.float32,
                                 -lim1, lim1),
        "b1": jax.random.uniform(k2, (1, hidden_dim), jnp.float32, -lim1, lim1),
        "w2": jax.random.uniform(k3, (hidden_dim, hidden_dim), jnp.float32,
                                 -lim2, lim2),
        "b2": jax.random.uniform(k4, (1, hidden_dim), jnp.float32, -lim2, lim2),
        "w3": jax.random.uniform(k5, (1, hidden_dim), jnp.float32,
                                 -init_w, init_w),
        "b3": jax.random.uniform(k6, (1, 1), jnp.float32, -init_w, init_w),
    }


def _reference_forward(state, params):
    h = jnp.maximum(state @ params["w1"] + params["b1"], 0.0)
    h = jnp.maximum(h @ params["w2"] + params["b2"], 0.0)
    return jnp.sum(h * params["w3"], axis=-1, keepdims=True) + params["b3"]


if __name__ == "__main__":
    STATE_DIM, HIDDEN_DIM = 4, 32
    # NOTE: hidden_dim=32 (module config) only fills 32/128 lanes per vreg;
    # a multiple of 128 would be essentially free on the MXU if tunable.

    key = jax.random.PRNGKey(0)
    k_params, k_small, k_big = jax.random.split(key, 3)
    params = init_value_network_params(k_params, STATE_DIM, HIDDEN_DIM)

    # 1) Small batch (module spec shapes), exact f32 semantics.
    state_small = jax.random.normal(k_small, (2, STATE_DIM), dtype=jnp.float32)
    out_small = jax.block_until_ready(value_network_forward(state_small, params))
    ref_small = _reference_forward(state_small, params)
    assert out_small.shape == (2, 1)
    assert jnp.allclose(out_small, ref_small, atol=1e-5, rtol=1e-5)

    # 2) Larger, non-tile-aligned batch: exercises grid > 1 + padding.
    state_big = jax.random.normal(k_big, (300, STATE_DIM), dtype=jnp.float32)
    out_big = jax.block_until_ready(
        value_network_forward(state_big, params, tile_b=128))
    ref_big = _reference_forward(state_big, params)
    assert out_big.shape == (300, 1)
    assert jnp.allclose(out_big, ref_big, atol=1e-5, rtol=1e-5)

    # 3) bf16 MXU-input path (v6e/v7x bandwidth optimization), f32 accumulate.
    out_bf16 = jax.block_until_ready(
        value_network_forward(state_big, params, tile_b=128,
                              matmul_dtype=jnp.bfloat16))
    assert out_bf16.shape == (300, 1)
    assert jnp.allclose(out_bf16, ref_big, atol=2e-3, rtol=2e-2)

    print("KERNEL_OK")
</pallas_src>

<mosaic_0001>
module attributes {stable_mosaic.version = 11 : i64} {
  func.func @_value_net_kernel(%arg0: i32, %arg1: memref<8x4xf32, #tpu.memory_space<vmem>>, %arg2: memref<4x32xf32, #tpu.memory_space<vmem>>, %arg3: memref<1x32xf32, #tpu.memory_space<vmem>>, %arg4: memref<32x32xf32, #tpu.memory_space<vmem>>, %arg5: memref<1x32xf32, #tpu.memory_space<vmem>>, %arg6: memref<1x32xf32, #tpu.memory_space<vmem>>, %arg7: memref<1x1xf32, #tpu.memory_space<vmem>>, %arg8: memref<8x1xf32, #tpu.memory_space<vmem>>) attributes {dimension_semantics = [#tpu.dimension_semantics<parallel>], iteration_bounds = array<i64: 1>, scalar_prefetch = 0 : i64, scratch_operands = 0 : i64, tpu.core_type = #tpu.core_type<tc>, window_params = [{transform_indices = @transform_0, window_bounds = array<i64: 8, 4>}, {pipeline_mode = #tpu.pipeline_mode<synchronous>, transform_indices = @transform_1, window_bounds = array<i64: 4, 32>}, {pipeline_mode = #tpu.pipeline_mode<synchronous>, transform_indices = @transform_2, window_bounds = array<i64: 1, 32>}, {pipeline_mode = #tpu.pipeline_mode<synchronous>, transform_indices = @transform_3, window_bounds = array<i64: 32, 32>}, {pipeline_mode = #tpu.pipeline_mode<synchronous>, transform_indices = @transform_4, window_bounds = array<i64: 1, 32>}, {pipeline_mode = #tpu.pipeline_mode<synchronous>, transform_indices = @transform_5, window_bounds = array<i64: 1, 32>}, {pipeline_mode = #tpu.pipeline_mode<synchronous>, transform_indices = @transform_6, window_bounds = array<i64: 1, 1>}, {transform_indices = @transform_7, window_bounds = array<i64: 8, 1>}]} {
    %c0 = arith.constant 0 : index
    %c0_0 = arith.constant 0 : index
    %0 = vector.load %arg1[%c0, %c0_0] : memref<8x4xf32, #tpu.memory_space<vmem>>, vector<8x4xf32>
    %c0_1 = arith.constant 0 : index
    %c0_2 = arith.constant 0 : index
    %1 = vector.load %arg2[%c0_1, %c0_2] : memref<4x32xf32, #tpu.memory_space<vmem>>, vector<4x32xf32>
    %cst = arith.constant dense<0.000000e+00> : vector<8x32xf32>
    %2 = tpu.matmul %0, %1, %cst {dimension_numbers = #tpu.dot_dimension_numbers<[1], [0], [0], [1], [0, 0, 1, 1], [], []>} : vector<8x4xf32>, vector<4x32xf32>, vector<8x32xf32> -> vector<8x32xf32>
    %c0_3 = arith.constant 0 : index
    %c0_4 = arith.constant 0 : index
    %3 = vector.load %arg3[%c0_3, %c0_4] : memref<1x32xf32, #tpu.memory_space<vmem>>, vector<1x32xf32>
    %4 = vector.broadcast %3 : vector<1x32xf32> to vector<8x32xf32>
    %5 = arith.addf %2, %4 : vector<8x32xf32>
    %cst_5 = arith.constant 0.000000e+00 : f32
    %6 = vector.broadcast %cst_5 : f32 to vector<8x32xf32>
    %7 = arith.maximumf %5, %6 : vector<8x32xf32>
    %c0_6 = arith.constant 0 : index
    %c0_7 = arith.constant 0 : index
    %8 = vector.load %arg4[%c0_6, %c0_7] : memref<32x32xf32, #tpu.memory_space<vmem>>, vector<32x32xf32>
    %cst_8 = arith.constant dense<0.000000e+00> : vector<8x32xf32>
    %9 = tpu.matmul %7, %8, %cst_8 {dimension_numbers = #tpu.dot_dimension_numbers<[1], [0], [0], [1], [0, 0, 1, 1], [], []>} : vector<8x32xf32>, vector<32x32xf32>, vector<8x32xf32> -> vector<8x32xf32>
    %c0_9 = arith.constant 0 : index
    %c0_10 = arith.constant 0 : index
    %10 = vector.load %arg5[%c0_9, %c0_10] : memref<1x32xf32, #tpu.memory_space<vmem>>, vector<1x32xf32>
    %11 = vector.broadcast %10 : vector<1x32xf32> to vector<8x32xf32>
    %12 = arith.addf %9, %11 : vector<8x32xf32>
    %cst_11 = arith.constant 0.000000e+00 : f32
    %13 = vector.broadcast %cst_11 : f32 to vector<8x32xf32>
    %14 = arith.maximumf %12, %13 : vector<8x32xf32>
    %c0_12 = arith.constant 0 : index
    %c0_13 = arith.constant 0 : index
    %15 = vector.load %arg6[%c0_12, %c0_13] : memref<1x32xf32, #tpu.memory_space<vmem>>, vector<1x32xf32>
    %16 = vector.broadcast %15 : vector<1x32xf32> to vector<8x32xf32>
    %17 = arith.mulf %14, %16 : vector<8x32xf32>
    %cst_14 = arith.constant dense<0.000000e+00> : vector<8xf32>
    %18 = vector.multi_reduction <add>, %17, %cst_14 [1] : vector<8x32xf32> to vector<8xf32>
    %19 = vector.shape_cast %18 : vector<8xf32> to vector<8x1xf32>
    %c0_15 = arith.constant 0 : index
    %c0_16 = arith.constant 0 : index
    %20 = vector.load %arg7[%c0_15, %c0_16] : memref<1x1xf32, #tpu.memory_space<vmem>>, vector<1x1xf32>
    %21 = vector.broadcast %20 : vector<1x1xf32> to vector<8x1xf32>
    %22 = arith.addf %19, %21 : vector<8x1xf32>
    %c0_17 = arith.constant 0 : index
    %c0_18 = arith.constant 0 : index
    %23 = vector.load %arg8[%c0_17, %c0_18] : memref<8x1xf32, #tpu.memory_space<vmem>>, vector<8x1xf32>
    tpu.vector_store %arg8[%c0_17, %c0_18], %22 {strides = array<i32>} : memref<8x1xf32, #tpu.memory_space<vmem>>, vector<8x1xf32>,
    return
  }
  func.func @transform_0(%arg0: i32) -> (i32, i32) {
    %c0_i32 = arith.constant 0 : i32
    %c0_i32_0 = arith.constant 0 : i32
    return %arg0, %c0_i32 : i32, i32
  }
  func.func @transform_1(%arg0: i32) -> (i32, i32) {
    %c0_i32 = arith.constant 0 : i32
    %c0_i32_0 = arith.constant 0 : i32
    %c0_i32_1 = arith.constant 0 : i32
    return %c0_i32, %c0_i32_0 : i32, i32
  }
  func.func @transform_2(%arg0: i32) -> (i32, i32) {
    %c0_i32 = arith.constant 0 : i32
    %c0_i32_0 = arith.constant 0 : i32
    %c0_i32_1 = arith.constant 0 : i32
    return %c0_i32, %c0_i32_0 : i32, i32
  }
  func.func @transform_3(%arg0: i32) -> (i32, i32) {
    %c0_i32 = arith.constant 0 : i32
    %c0_i32_0 = arith.constant 0 : i32
    %c0_i32_1 = arith.constant 0 : i32
    return %c0_i32, %c0_i32_0 : i32, i32
  }
  func.func @transform_4(%arg0: i32) -> (i32, i32) {
    %c0_i32 = arith.constant 0 : i32
    %c0_i32_0 = arith.constant 0 : i32
    %c0_i32_1 = arith.constant 0 : i32
    return %c0_i32, %c0_i32_0 : i32, i32
  }
  func.func @transform_5(%arg0: i32) -> (i32, i32) {
    %c0_i32 = arith.constant 0 : i32
    %c0_i32_0 = arith.constant 0 : i32
    %c0_i32_1 = arith.constant 0 : i32
    return %c0_i32, %c0_i32_0 : i32, i32
  }
  func.func @transform_6(%arg0: i32) -> (i32, i32) {
    %c0_i32 = arith.constant 0 : i32
    %c0_i32_0 = arith.constant 0 : i32
    %c0_i32_1 = arith.constant 0 : i32
    return %c0_i32, %c0_i32_0 : i32, i32
  }
  func.func @transform_7(%arg0: i32) -> (i32, i32) {
    %c0_i32 = arith.constant 0 : i32
    %c0_i32_0 = arith.constant 0 : i32
    return %arg0, %c0_i32 : i32, i32
  }
}

</mosaic_0001>

<bundles_post_ra>
// kernel: value_network_forward.1
= control target key start
LH: loop header
LB: loop body
LE: loop exit
PB: predicated region body
PF: predicated region fallthrough
CT: control target
= control target key end

     0   :  { %s387_s0 = inlined_call_operand.vmem [shape: f32[8,4], index: 0, kind: input, shape index: {}]   ;;  %s388_s1 = inlined_call_operand.vmem [shape: f32[4,32], index: 1, kind: input, shape index: {}]   ;;  %s389_s2 = inlined_call_operand.vmem [shape: f32[1,32], index: 2, kind: input, shape index: {}]   ;;  %s390_s3 = inlined_call_operand.hbm [shape: f32[32,32], index: 3, kind: input, shape index: {}]   ;;  %s391_s4 = inlined_call_operand.vmem [shape: f32[1,32], index: 4, kind: input, shape index: {}]   ;;  %s392_s5 = inlined_call_operand.vmem [shape: f32[1,32], index: 5, kind: input, shape index: {}]   ;;  %s393_s6 = inlined_call_operand.<no memory space> [shape: f32[1,1], index: 6, kind: input, shape index: {}]   ;;  %s394_s7 = inlined_call_operand.vmem [shape: f32[8,1], index: 7, kind: output, shape index: {}]  }
   0x1   :  { %v12_v0 = vstv %s393_s6 }
   0x2   :  { %13 = vst [vmem:[#allocation2] sm:$0x1] %v12_v0 }
   0x3   :  { %14 = vsyncpa [#allocation4], 0  ;;  %s308_s26 = smov [#allocation3]   ;;  %s284_s30 = scalar_lea.hbm %s390_s3, 512 }
   0x4   :  { %s26_s27 = sshll.u32 %s308_s26, 4  ;;  %p285_p0 = scmp.ne.s32.totalorder %s390_s3, %s284_s30  ;;  %s27_s27 = int_to_ptr.vmem [resolvable:$true] %s26_s27 }
   0x5   :  { %p288_p1 = scmp.lt.u32.totalorder %s284_s30, %s390_s3 }
   0x7   :  { %p290_p2 = pnand %p288_p1, %p285_p0 }
   0x9   :  { %293 = shalt.err (!%p290_p2)
}
   0xa   :  { %s294_s6 = scalar_lea.vmem %s27_s27, 512  ;;  %p299_p4 = scmp.lt.s32.totalorder %s27_s27, %s27_s27 }
   0xb   :  { %p295_p3 = scmp.ne.s32.totalorder %s27_s27, %s294_s6  ;;  %p300_p5 = scmp.lt.s32.totalorder %s294_s6, %s294_s6 }
   0xd   :  { %p301_p6 = por %p300_p5, %p299_p4 }
   0xf   :  { %p302_p7 = pnand %p301_p6, %p295_p3 }
  0x11   :  { %305 = shalt.err (!%p302_p7)
}
  0x12   :  { %s309_s12 = smov 128   ;;  %s310_s13 = smov 8  }
  0x13   :  { %32 = dma.hbm_to_vmem [thread:$0]  %s390_s3, 512, %s27_s27, [#allocation4], %s309_s12, %s309_s12, %s310_s13  }
  0x14   :  { %306 = dma.done.wait [#allocation4], 512  }
  0x15   :  { %307 = vsyncadd [#allocation4], 4294966784  ;;  %v311_v1 = vmov 0.0   ;;  %vm312_vm0 = vmmov 0   ;;  %v313_v2 = vmov 0.0|0.0   ;;  %vm55_vm1 = vcmask 1043456  }
  0x16   :  { %256 = vmatprep.subr.mxu0 %v311_v1  ;;  %258 = vmatprep.mubr.msk.f32.mxu0 %vm312_vm0, %v311_v1  ;;  %vm51_vm2 = vcmask 31744   ;;  %v43_v3 = vld [vmem:[%s388_s1] sm:$0xf]  ;;  %v131_v6 = vld [vmem:[#allocation3 + $0x8] sm:$0xff]  ;;  %v132_v8 = vld [vmem:[#allocation3 + $0x10] sm:$0xff]  ;;  %vm141_vm3 = vcmask 261120  }
  0x17   :  { %272 = vmatprep.subr.bf16.mxu1 %v313_v2  ;;  %269 = vmatprep.mubr.msk.f32.mxu1 %vm312_vm0, %v311_v1  ;;  %v42_v4 = vld [vmem:[%s387_s0] sm:$0xff]  ;;  %vm235_vm4 = vcmask 7168  }
  0x18   :  { %v130_v5 = vld [vmem:[#allocation3] sm:$0xff]  ;;  %257 = vmatpush3.msk.msra.mxu0 %vm55_vm1, %v43_v3  ;;  %v133_v9 = vld [vmem:[#allocation3 + $0x18] sm:$0xff] }
  0x19   :  { %259 = vmatmul.mubr.msk.f32.vlgmr.msra.gmra.mrb[0].mxu0 %vm51_vm2, %v42_v4  ;;  %v273_v7 = vpack.c.bf16 %v131_v6, %v130_v5  ;;  %v276_v10 = vpack.c.bf16 %v133_v9, %v132_v8  ;;  %v242_v11 = vld [vmem:[%s389_s2] ss:$0 sm:$0xff] }
  0x1a   :  { %v245_v16 = vld [vmem:[%s391_s4] ss:$0 sm:$0xff] }
  0x1b   :  { %274 = vmatpush3.bf16.msra.mxu1 %v273_v7  ;;  %v247_v20 = vld [vmem:[%s392_s5] ss:$0 sm:$0xff] }
  0x1c   :  { %275 = vmatprep.subr.bf16.mxu1 %v313_v2  ;;  %v248_v24 = vld [vmem:[#allocation2] ss:$0 sm:$0xff] }
  0x1f   :  { %277 = vmatpush3.bf16.msra.mxu1 %v276_v10 }
  0xec   :  { %v125_v12 = vpop.f32.mrb[0].mxu0 }
  0xed   :  { %v126_v13 = vadd.f32 %v242_v11, %v125_v12  ;;  %v260_v14 = vpop.f32.mrb[1].mxu0 }
  0xef   :  { %v129_v15 = vmax.f32 %v126_v13, 0.0 }
  0xf1   :  { %270 = vmatmul.mubr.msk.f32.vlgmr.msra.gmra.mrb[0].mxu1 %vm141_vm3, %v129_v15 }
 0x1c4   :  { %v211_v17 = vpop.f32.mrb[0].mxu1 }
 0x1c5   :  { %v212_v18 = vadd.f32 %v245_v16, %v211_v17  ;;  %v271_v19 = vpop.f32.mrb[1].mxu1 }
 0x1c7   :  { %v215_v21 = vmax.f32 %v212_v18, 0.0 }
 0x1c9   :  { %v223_v22 = vmul.f32 %v247_v20, %v215_v21 }
 0x1cb   :  { %v224_v23 = vsel %vm141_vm3, %v223_v22, 0.0 }
 0x1cc   :  { %225 = vadd.xlane.f32.xlu0 %v224_v23 }
 0x259   :  { %v226_v25 = vpop.xlane.xlu0 %225 }
 0x25a   :  { %v234_v26 = vadd.f32 %v248_v24, %v226_v25 }
 0x25c   :  { %236 = vst.msk [vmem:[%s394_s7] sm:$0xff] %vm235_vm4, %v234_v26 }
 0x25d   :  { %241 = vsyncpa [#allocation4], 1 }

</bundles_post_ra>
